<compile_context>
chip_gen: v5e
topology: v5e:2x2
jax: 0.10.0
libtpu: 0.0.40
codegen_flags: <defaults>
</compile_context>

<pallas_src>
import functools

import jax
import jax.numpy as jnp
from jax.experimental import pallas as pl
from jax.experimental.pallas import tpu as pltpu

LANES = 128
SUBLANES = 8


def _focal_bce_sum_kernel(x_ref, t_ref, o_ref, acc_ref, *,
                          total_elems, num_rows, tile_rows,
                          steps_per_split, n_splits):
    c = pl.program_id(0)   # parallel split (both TensorCores on v7x)
    s = pl.program_id(1)   # sequential reduction steps within a split

    @pl.when(s == 0)
    def _():
        acc_ref[...] = jnp.zeros_like(acc_ref)

    x = x_ref[...].astype(jnp.float32)
    t = t_ref[...].astype(jnp.float32)

    # BCE with logits:
    #   log p     = -softplus(-x)
    #   log (1-p) = -softplus(x)
    #   softplus(z) = max(z, 0) + log1p(exp(-|z|))
    # Only 1 exp + 1 log1p per element; clamp log-prob terms at -100 (torch BCE parity).
    sp = jnp.log1p(jnp.exp(-jnp.abs(x)))
    log_p = jnp.maximum(-(jnp.maximum(-x, 0.0) + sp), -100.0)
    log_1mp = jnp.maximum(-(jnp.maximum(x, 0.0) + sp), -100.0)
    elem = -(t * log_p + (1.0 - t) * log_1mp)

    # Mask ragged tails (only emitted when actually needed — static decision).
    needs_row_mask = (n_splits * steps_per_split * tile_rows) != num_rows
    needs_lane_mask = (total_elems % LANES) != 0
    if needs_row_mask or needs_lane_mask:
        block_idx = c * steps_per_split + s
        row_ids = jax.lax.broadcasted_iota(jnp.int32, (tile_rows, LANES), 0)
        if needs_lane_mask:
            lane_ids = jax.lax.broadcasted_iota(jnp.int32, (tile_rows, LANES), 1)
            flat_idx = (block_idx * tile_rows + row_ids) * LANES + lane_ids
            mask = flat_idx < total_elems
        else:
            mask = (block_idx * tile_rows + row_ids) < num_rows
        elem = jnp.where(mask, elem, 0.0)

    # Vreg-shaped accumulator: pure VPU adds each step; no per-step XLU scalar reduce.
    if tile_rows % SUBLANES == 0:
        acc_ref[...] += elem.reshape(tile_rows // SUBLANES, SUBLANES, LANES).sum(axis=0)
    else:
        # Tiny-input fallback (single grid step); cross-sublane reduce once is fine.
        acc_ref[0:1, :] += elem.sum(axis=0, keepdims=True)

    @pl.when(s == steps_per_split - 1)
    def _():
        o_ref[...] = acc_ref[...]


def focal_loss(inputs, targets, alpha=0.8, gamma=2, *, tile_rows=1024):
    """inputs/targets: any shape (e.g. NCHW). Returns scalar float32 focal loss."""
    x = jnp.reshape(inputs, (-1,))
    t = jnp.reshape(targets, (-1,))
    total = int(x.shape[0])

    # Pad only up to the next multiple of 128 lanes (<128 elems); masked in-kernel.
    pad = (-total) % LANES
    if pad:
        x = jnp.pad(x, (0, pad))
        t = jnp.pad(t, (0, pad))
    rows = (total + pad) // LANES
    x2 = x.reshape(rows, LANES)
    t2 = t.reshape(rows, LANES)

    # Row tile: big (amortize per-step overhead) but never larger than the array.
    tile = min(tile_rows, rows)
    n_blocks = pl.cdiv(rows, tile)
    # Split row-blocks across two TensorCores (v7x) when it divides evenly.
    n_splits = 2 if (n_blocks >= 2 and n_blocks % 2 == 0) else 1
    steps = n_blocks // n_splits

    kernel = functools.partial(
        _focal_bce_sum_kernel,
        total_elems=total,
        num_rows=rows,
        tile_rows=tile,
        steps_per_split=steps,
        n_splits=n_splits,
    )

    partial_sums = pl.pallas_call(
        kernel,
        out_shape=jax.ShapeDtypeStruct((n_splits * SUBLANES, LANES), jnp.float32),
        grid_spec=pltpu.PrefetchScalarGridSpec(
            num_scalar_prefetch=0,
            grid=(n_splits, steps),
            in_specs=[
                pl.BlockSpec((tile, LANES), lambda c, s: (c * steps + s, 0)),
                pl.BlockSpec((tile, LANES), lambda c, s: (c * steps + s, 0)),
            ],
            out_specs=pl.BlockSpec((SUBLANES, LANES), lambda c, s: (c, 0)),
            scratch_shapes=[pltpu.VMEM((SUBLANES, LANES), jnp.float32)],
        ),
        compiler_params=pltpu.CompilerParams(
            dimension_semantics=("parallel", "arbitrary"),
            vmem_limit_bytes=32 * 1024 * 1024,
        ),
    )(x2, t2)

    # Tiny scalar epilogue: mean + focal transform.
    bce = jnp.sum(partial_sums) / jnp.float32(total)
    return jnp.float32(alpha) * (1.0 - jnp.exp(-bce)) ** gamma * bce


def _focal_loss_ref(inputs, targets, alpha=0.8, gamma=2):
    p = jax.nn.sigmoid(inputs.astype(jnp.float32)).ravel()
    t = targets.astype(jnp.float32).ravel()
    bce = jnp.mean(
        -(t * jnp.maximum(jnp.log(p), -100.0)
          + (1.0 - t) * jnp.maximum(jnp.log(1.0 - p), -100.0))
    )
    return alpha * (1.0 - jnp.exp(-bce)) ** gamma * bce


if __name__ == "__main__":
    key = jax.random.PRNGKey(0)
    k1, k2 = jax.random.split(key)
    # NCHW logits and binary targets.
    x = jax.random.normal(k1, (2, 4, 16, 16), dtype=jnp.float32)
    t = (jax.random.uniform(k2, (2, 4, 16, 16)) > 0.5).astype(jnp.float32)

    out = focal_loss(x, t, alpha=0.8, gamma=2)
    out = jax.block_until_ready(out)

    ref = _focal_loss_ref(x, t, alpha=0.8, gamma=2)
    assert jnp.allclose(out, ref, rtol=1e-5, atol=1e-6), (out, ref)
    print("KERNEL_OK")
</pallas_src>

<mosaic_0001>
module attributes {stable_mosaic.version = 11 : i64} {
  func.func @_focal_bce_sum_kernel(%arg0: i32, %arg1: i32, %arg2: memref<16x128xf32, #tpu.memory_space<vmem>>, %arg3: memref<16x128xf32, #tpu.memory_space<vmem>>, %arg4: memref<8x128xf32, #tpu.memory_space<vmem>>, %arg5: memref<8x128xf32, #tpu.memory_space<vmem>>) attributes {dimension_semantics = [#tpu.dimension_semantics<parallel>, #tpu.dimension_semantics<arbitrary>], iteration_bounds = array<i64: 1, 1>, scalar_prefetch = 0 : i64, scratch_operands = 1 : i64, tpu.core_type = #tpu.core_type<tc>, window_params = [{transform_indices = @transform_0, window_bounds = array<i64: 16, 128>}, {transform_indices = @transform_1, window_bounds = array<i64: 16, 128>}, {transform_indices = @transform_2, window_bounds = array<i64: 8, 128>}]} {
    %c0_i32 = arith.constant 0 : i32
    %0 = arith.cmpi eq, %arg1, %c0_i32 : i32
    %1 = arith.extui %0 : i1 to i32
    %c0_i32_0 = arith.constant 0 : i32
    %2 = arith.cmpi ne, %1, %c0_i32_0 : i32
    scf.if %2 {
      %cst_20 = arith.constant 0.000000e+00 : f32
      %41 = vector.broadcast %cst_20 : f32 to vector<8x128xf32>
      %c0_21 = arith.constant 0 : index
      %c0_22 = arith.constant 0 : index
      %42 = vector.load %arg5[%c0_21, %c0_22] : memref<8x128xf32, #tpu.memory_space<vmem>>, vector<8x128xf32>
      tpu.vector_store %arg5[%c0_21, %c0_22], %41 {strides = array<i32>} : memref<8x128xf32, #tpu.memory_space<vmem>>, vector<8x128xf32>,
    } else {
    }
    %c0 = arith.constant 0 : index
    %c0_1 = arith.constant 0 : index
    %3 = vector.load %arg2[%c0, %c0_1] : memref<16x128xf32, #tpu.memory_space<vmem>>, vector<16x128xf32>
    %c0_2 = arith.constant 0 : index
    %c0_3 = arith.constant 0 : index
    %4 = vector.load %arg3[%c0_2, %c0_3] : memref<16x128xf32, #tpu.memory_space<vmem>>, vector<16x128xf32>
    %5 = math.absf %3 : vector<16x128xf32>
    %cst = arith.constant 0.000000e+00 : f32
    %6 = vector.broadcast %cst : f32 to vector<16x128xf32>
    %7 = arith.subf %6, %5 : vector<16x128xf32>
    %8 = math.exp %7 : vector<16x128xf32>
    %9 = math.log1p %8 : vector<16x128xf32>
    %cst_4 = arith.constant 0.000000e+00 : f32
    %10 = vector.broadcast %cst_4 : f32 to vector<16x128xf32>
    %11 = arith.subf %10, %3 : vector<16x128xf32>
    %cst_5 = arith.constant 0.000000e+00 : f32
    %12 = vector.broadcast %cst_5 : f32 to vector<16x128xf32>
    %13 = arith.maximumf %11, %12 : vector<16x128xf32>
    %14 = arith.addf %13, %9 : vector<16x128xf32>
    %cst_6 = arith.constant 0.000000e+00 : f32
    %15 = vector.broadcast %cst_6 : f32 to vector<16x128xf32>
    %16 = arith.subf %15, %14 : vector<16x128xf32>
    %cst_7 = arith.constant -1.000000e+02 : f32
    %17 = vector.broadcast %cst_7 : f32 to vector<16x128xf32>
    %18 = arith.maximumf %16, %17 : vector<16x128xf32>
    %cst_8 = arith.constant 0.000000e+00 : f32
    %19 = vector.broadcast %cst_8 : f32 to vector<16x128xf32>
    %20 = arith.maximumf %3, %19 : vector<16x128xf32>
    %21 = arith.addf %20, %9 : vector<16x128xf32>
    %cst_9 = arith.constant 0.000000e+00 : f32
    %22 = vector.broadcast %cst_9 : f32 to vector<16x128xf32>
    %23 = arith.subf %22, %21 : vector<16x128xf32>
    %cst_10 = arith.constant -1.000000e+02 : f32
    %24 = vector.broadcast %cst_10 : f32 to vector<16x128xf32>
    %25 = arith.maximumf %23, %24 : vector<16x128xf32>
    %26 = arith.mulf %4, %18 : vector<16x128xf32>
    %cst_11 = arith.constant 1.000000e+00 : f32
    %27 = vector.broadcast %cst_11 : f32 to vector<16x128xf32>
    %28 = arith.subf %27, %4 : vector<16x128xf32>
    %29 = arith.mulf %28, %25 : vector<16x128xf32>
    %30 = arith.addf %26, %29 : vector<16x128xf32>
    %cst_12 = arith.constant 0.000000e+00 : f32
    %31 = vector.broadcast %cst_12 : f32 to vector<16x128xf32>
    %32 = arith.subf %31, %30 : vector<16x128xf32>
    %c0_13 = arith.constant 0 : index
    %c0_14 = arith.constant 0 : index
    %33 = vector.load %arg5[%c0_13, %c0_14] : memref<8x128xf32, #tpu.memory_space<vmem>>, vector<8x128xf32>
    %34 = vector.shape_cast %32 : vector<16x128xf32> to vector<2x8x128xf32>
    %cst_15 = arith.constant dense<0.000000e+00> : vector<8x128xf32>
    %35 = vector.multi_reduction <add>, %34, %cst_15 [0] : vector<2x8x128xf32> to vector<8x128xf32>
    %36 = arith.addf %33, %35 : vector<8x128xf32>
    %c0_16 = arith.constant 0 : index
    %c0_17 = arith.constant 0 : index
    %37 = vector.load %arg5[%c0_16, %c0_17] : memref<8x128xf32, #tpu.memory_space<vmem>>, vector<8x128xf32>
    tpu.vector_store %arg5[%c0_16, %c0_17], %36 {strides = array<i32>} : memref<8x128xf32, #tpu.memory_space<vmem>>, vector<8x128xf32>,
    %c0_i32_18 = arith.constant 0 : i32
    %38 = arith.cmpi eq, %arg1, %c0_i32_18 : i32
    %39 = arith.extui %38 : i1 to i32
    %c0_i32_19 = arith.constant 0 : i32
    %40 = arith.cmpi ne, %39, %c0_i32_19 : i32
    scf.if %40 {
      %c0_20 = arith.constant 0 : index
      %c0_21 = arith.constant 0 : index
      %41 = vector.load %arg5[%c0_20, %c0_21] : memref<8x128xf32, #tpu.memory_space<vmem>>, vector<8x128xf32>
      %c0_22 = arith.constant 0 : index
      %c0_23 = arith.constant 0 : index
      %42 = vector.load %arg4[%c0_22, %c0_23] : memref<8x128xf32, #tpu.memory_space<vmem>>, vector<8x128xf32>
      tpu.vector_store %arg4[%c0_22, %c0_23], %41 {strides = array<i32>} : memref<8x128xf32, #tpu.memory_space<vmem>>, vector<8x128xf32>,
    } else {
    }
    return
  }
  func.func @transform_0(%arg0: i32, %arg1: i32) -> (i32, i32) {
    %c1_i32 = arith.constant 1 : i32
    %0 = arith.muli %arg0, %c1_i32 : i32
    %1 = arith.addi %0, %arg1 : i32
    %c0_i32 = arith.constant 0 : i32
    %c0_i32_0 = arith.constant 0 : i32
    return %1, %c0_i32 : i32, i32
  }
  func.func @transform_1(%arg0: i32, %arg1: i32) -> (i32, i32) {
    %c1_i32 = arith.constant 1 : i32
    %0 = arith.muli %arg0, %c1_i32 : i32
    %1 = arith.addi %0, %arg1 : i32
    %c0_i32 = arith.constant 0 : i32
    %c0_i32_0 = arith.constant 0 : i32
    return %1, %c0_i32 : i32, i32
  }
  func.func @transform_2(%arg0: i32, %arg1: i32) -> (i32, i32) {
    %c0_i32 = arith.constant 0 : i32
    %c0_i32_0 = arith.constant 0 : i32
    return %arg0, %c0_i32 : i32, i32
  }
}

</mosaic_0001>

<bundles_post_ra>
// kernel: tpu_custom_call.1
= control target key start
LH: loop header
LB: loop body
LE: loop exit
PB: predicated region body
PF: predicated region fallthrough
CT: control target
= control target key end

     0   :  { %7 = vsyncpa [#allocation4], 0  ;;  %s266_s0 = inlined_call_operand.hbm [shape: f32[16,128], index: 0, kind: input, shape index: {}]   ;;  %s267_s1 = inlined_call_operand.hbm [shape: f32[16,128], index: 1, kind: input, shape index: {}]   ;;  %s268_s2 = inlined_call_operand.hbm [shape: f32[8,128], index: 2, kind: output, shape index: {}]  }
   0x1   :  { %8 = vsyncpa [#allocation7], 0 }
   0x2   :  { %9 = vsyncpa [#allocation5], 0  ;;  %s18_s11 = sshll.u32 %s266_s0, 4  ;;  %s237_s12 = smov [#allocation3]   ;;  %s19_s11 = int_to_ptr.hbm [resolvable:$true] %s18_s11 }
   0x3   :  { %s20_s13 = sshll.u32 %s237_s12, 4  ;;  %s35_s16 = sshll.u32 %s267_s1, 4  ;;  %s21_s13 = int_to_ptr.vmem [resolvable:$true] %s20_s13  ;;  %s36_s16 = int_to_ptr.hbm [resolvable:$true] %s35_s16 }
   0x4   :  { %s238_s17 = smov 128   ;;  %s239_s18 = smov 8  }
   0x5   :  { %26 = dma.hbm_to_vmem [thread:$0]  %s19_s11, 256, %s21_s13, [#allocation4], %s238_s17, %s238_s17, %s239_s18  }
   0x6   :  { %s240_s19 = smov [#allocation6]  }
   0x7   :  { %s37_s20 = sshll.u32 %s240_s19, 4  ;;  %s38_s20 = int_to_ptr.vmem [resolvable:$true] %s37_s20 }
   0x8   :  { %43 = dma.hbm_to_vmem [thread:$0]  %s36_s16, 256, %s38_s20, [#allocation7], %s238_s17, %s238_s17, %s239_s18  }
   0x9   :  { %231 = dma.done.wait [#allocation4], 256  }
   0xa   :  { %232 = vsyncadd [#allocation4], 4294967040 }
   0xb   :  { %233 = dma.done.wait [#allocation7], 256  }
   0xc   :  { %234 = vsyncadd [#allocation7], 4294967040  ;;  %v61_v0 = vld [vmem:[#allocation3] sm:$0xff]  ;;  %v62_v1 = vld [vmem:[#allocation3 + $0x8] sm:$0xff]  ;;  %s241_s0 = smov [#allocation8]   ;;  %s135_s23 = sshll.u32 %s268_s2, 4  ;;  %s136_s23 = int_to_ptr.hbm [resolvable:$true] %s135_s23 }
   0xd   :  { %v65_v2 = vand.u32 2147483647, %v61_v0  ;;  %v66_v3 = vand.u32 2147483647, %v62_v1  ;;  %v91_v17 = vsub.f32 0.0, %v61_v0  ;;  %v92_v19 = vsub.f32 0.0, %v62_v1 }
   0xe   :  { %v101_v24 = vmax.f32 %v61_v0, 0.0  ;;  %v102_v28 = vmax.f32 %v62_v1, 0.0  ;;  %v63_v30 = vld [vmem:[#allocation6] sm:$0xff]  ;;  %v64_v32 = vld [vmem:[#allocation6 + $0x8] sm:$0xff]  ;;  %s133_s1 = sshll.u32 %s241_s0, 4  ;;  %s134_s1 = int_to_ptr.vmem [resolvable:$true] %s133_s1 }
   0xf   :  { %v67_v4 = vsub.f32 0.0, %v65_v2  ;;  %v68_v5 = vsub.f32 0.0, %v66_v3  ;;  %v93_v23 = vmax.f32 %v91_v17, 0.0  ;;  %v94_v27 = vmax.f32 %v92_v19, 0.0 }
  0x10   :  { %v111_v40 = vsub.f32 1.0, %v63_v30  ;;  %v112_v43 = vsub.f32 1.0, %v64_v32 }
  0x11   :  { %v69_v6 = vmul.f32 1.442695, %v67_v4  ;;  %v71_v7 = vmul.f32 1.442695, %v68_v5 }
  0x13   :  { %151 = vpow2.f32 %v69_v6 }
  0x14   :  { %153 = vpow2.f32 %v71_v7 }
  0x19   :  { %v152_v8 = vpop.eup %151 }
  0x1a   :  { %v154_v9 = vpop.eup %153  ;;  %v73_v10 = vadd.f32 1.0, %v152_v8  ;;  %v76_v11 = vmul.f32 -0.5, %v152_v8  ;;  %v79_v15 = vand.u32 2147483647, %v152_v8 }
  0x1b   :  { %v82_v12 = vadd.f32 1.0, %v154_v9  ;;  %v85_v13 = vmul.f32 -0.5, %v154_v9  ;;  %v88_v18 = vand.u32 2147483647, %v154_v9 }
  0x1c   :  { %155 = vlog2.f32 %v73_v10  ;;  %v77_v14 = vadd.f32 1.0, %v76_v11  ;;  %vm80_vm0 = vcmp.lt.f32.partialorder %v79_v15, 0.0004427343 }
  0x1d   :  { %157 = vlog2.f32 %v82_v12  ;;  %v86_v16 = vadd.f32 1.0, %v85_v13  ;;  %vm89_vm1 = vcmp.lt.f32.partialorder %v88_v18, 0.0004427343 }
  0x1e   :  { %v78_v20 = vmul.f32 %v152_v8, %v77_v14 }
  0x1f   :  { %v87_v22 = vmul.f32 %v154_v9, %v86_v16 }
  0x22   :  { %v156_v21 = vpop.eup %155 }
  0x23   :  { %v158_v25 = vpop.eup %157  ;;  %v75_v26 = vmul.f32 0.6931472, %v156_v21 }
  0x24   :  { %v84_v29 = vmul.f32 0.6931472, %v158_v25 }
  0x25   :  { %v81_v31 = vsel %vm80_vm0, %v78_v20, %v75_v26 }
  0x26   :  { %v90_v33 = vsel %vm89_vm1, %v87_v22, %v84_v29  ;;  %v95_v34 = vadd.f32 %v93_v23, %v81_v31  ;;  %v103_v35 = vadd.f32 %v101_v24, %v81_v31 }
  0x27   :  { %v96_v36 = vadd.f32 %v94_v27, %v90_v33  ;;  %v104_v37 = vadd.f32 %v102_v28, %v90_v33 }
  0x28   :  { %v97_v38 = vsub.f32 0.0, %v95_v34  ;;  %v105_v39 = vsub.f32 0.0, %v103_v35 }
  0x29   :  { %v98_v41 = vsub.f32 0.0, %v96_v36  ;;  %v106_v42 = vsub.f32 0.0, %v104_v37 }
  0x2a   :  { %v99_v44 = vmax.f32 %v97_v38, -100.0  ;;  %v107_v45 = vmax.f32 %v105_v39, -100.0 }
  0x2b   :  { %v100_v46 = vmax.f32 %v98_v41, -100.0  ;;  %v108_v47 = vmax.f32 %v106_v42, -100.0 }
  0x2c   :  { %v109_v48 = vmul.f32 %v99_v44, %v63_v30  ;;  %v113_v49 = vmul.f32 %v111_v40, %v107_v45 }
  0x2d   :  { %v110_v50 = vmul.f32 %v100_v46, %v64_v32  ;;  %v114_v51 = vmul.f32 %v112_v43, %v108_v47 }
  0x2e   :  { %v115_v52 = vadd.f32 %v113_v49, %v109_v48 }
  0x2f   :  { %v116_v53 = vadd.f32 %v114_v51, %v110_v50 }
  0x30   :  { %v117_v54 = vsub.f32 0.0, %v115_v52 }
  0x31   :  { %v118_v55 = vsub.f32 0.0, %v116_v53 }
  0x33   :  { %v120_v56 = vadd.f32 %v118_v55, %v117_v54 }
  0x35   :  { %127 = vst [vmem:[#allocation8] sm:$0xff] %v120_v56 }
  0x36   :  { %138 = dma.vmem_to_hbm [thread:$0]  %s134_s1, 128, %s136_s23, [#allocation5]  }
  0x37   :  { %235 = dma.done.wait [#allocation5], 128  }
  0x38   :  { %236 = vsyncadd [#allocation5], 4294967168 }
  0x39   :  { %143 = vsyncpa [#allocation4], 1 }
  0x3a   :  { %144 = vsyncpa [#allocation7], 1 }
  0x3b   :  { %145 = vsyncpa [#allocation5], 1 }

</bundles_post_ra>
